<compile_context>
chip_gen: v6e
topology: v6e:2x2x1
jax: 0.10.0
libtpu: 0.0.40
codegen_flags: <defaults>
</compile_context>

<pallas_src>
import jax
import jax.numpy as jnp
from jax.experimental import pallas as pl
from jax.experimental.pallas import tpu as pltpu


def _round_up(x, m):
    return ((x + m - 1) // m) * m


def _mlp_gpr_kernel(xT_ref, w1_ref, b1_ref, w2_ref, b2_ref, o_ref):
    """GPR branch: out = W2 @ tanh(W1 @ xT + b1) + b2, batch on the lane axis."""
    h = jnp.dot(w1_ref[...], xT_ref[...],
                preferred_element_type=jnp.float32)          # [nclass, tb] f32
    h = jnp.tanh(h + b1_ref[...])                            # bias bcasts over lanes
    z = jnp.dot(w2_ref[...], h.astype(w2_ref.dtype),
                preferred_element_type=jnp.float32)          # [nclass, tb] f32
    o_ref[...] = (z + b2_ref[...]).astype(o_ref.dtype)


def _mlp_nogpr_kernel(xT_ref, w1_ref, b1_ref, o_ref):
    """Non-GPR branch: out = W1 @ xT + b1."""
    h = jnp.dot(w1_ref[...], xT_ref[...],
                preferred_element_type=jnp.float32)          # [nclass, tb] f32
    o_ref[...] = (h + b1_ref[...]).astype(o_ref.dtype)


def mlp_forward(x, params, GPR=True, *, batch_tile=4096,
                compute_dtype=jnp.float32):
    """JAX wrapper around the fused Pallas MLP.

    params = (w1, b1, w2, b2) with weights in PyTorch [out, in] layout.
    Batch rows are padded to a multiple of the (lane-axis) batch tile and the
    result is sliced back, so any batch size is accepted.
    """
    w1, b1, w2, b2 = params
    x = jnp.asarray(x, jnp.float32)          # torch.from_numpy equivalent
    B, nhid = x.shape
    nclass = w1.shape[0]

    # Batch lives on the lane axis -> tiles must be multiples of 128.
    bt = max(128, min(_round_up(batch_tile, 128), _round_up(B, 128)))
    Bp = _round_up(B, bt)
    grid = (Bp // bt,)

    # Single fused layout op on the wrapper side: cast -> transpose -> pad the
    # lane (batch) axis.  Padding the last axis of the already-transposed
    # array keeps this one XLA copy (and a no-op pad when B % bt == 0).
    xT = jnp.pad(x.astype(compute_dtype).T, ((0, 0), (0, Bp - B)))

    w1c = w1.astype(compute_dtype)
    b1c = b1.reshape(nclass, 1).astype(jnp.float32)

    cparams = pltpu.CompilerParams(
        dimension_semantics=("parallel",),
        vmem_limit_bytes=32 * 1024 * 1024)

    x_spec = pl.BlockSpec((nhid, bt), lambda i: (0, i))         # xT tile (lane-dense)
    o_spec = pl.BlockSpec((nclass, bt), lambda i: (0, i))       # out tile (lane-dense)
    w1_spec = pl.BlockSpec((nclass, nhid), lambda i: (0, 0))    # resident in VMEM
    b_spec = pl.BlockSpec((nclass, 1), lambda i: (0, 0))        # resident in VMEM

    itemsize = jnp.dtype(compute_dtype).itemsize

    if GPR:
        w2c = w2.astype(compute_dtype)
        b2c = b2.reshape(nclass, 1).astype(jnp.float32)
        cost = pl.CostEstimate(
            flops=2 * Bp * nclass * (nhid + nclass),
            transcendentals=Bp * nclass,
            bytes_accessed=(Bp * nhid + nclass * (nhid + nclass)) * itemsize
                           + Bp * nclass * 4)
        outT = pl.pallas_call(
            _mlp_gpr_kernel,
            out_shape=jax.ShapeDtypeStruct((nclass, Bp), jnp.float32),
            grid_spec=pltpu.PrefetchScalarGridSpec(
                num_scalar_prefetch=0,
                grid=grid,
                in_specs=[
                    x_spec,                                           # xT tile
                    w1_spec,                                          # w1
                    b_spec,                                           # b1
                    pl.BlockSpec((nclass, nclass), lambda i: (0, 0)), # w2
                    b_spec,                                           # b2
                ],
                out_specs=o_spec,
            ),
            compiler_params=cparams,
            cost_estimate=cost,
        )(xT, w1c, b1c, w2c, b2c)
    else:
        cost = pl.CostEstimate(
            flops=2 * Bp * nclass * nhid,
            transcendentals=0,
            bytes_accessed=(Bp * nhid + nclass * nhid) * itemsize
                           + Bp * nclass * 4)
        outT = pl.pallas_call(
            _mlp_nogpr_kernel,
            out_shape=jax.ShapeDtypeStruct((nclass, Bp), jnp.float32),
            grid_spec=pltpu.PrefetchScalarGridSpec(
                num_scalar_prefetch=0,
                grid=grid,
                in_specs=[x_spec, w1_spec, b_spec],
                out_specs=o_spec,
            ),
            compiler_params=cparams,
            cost_estimate=cost,
        )(xT, w1c, b1c)

    # Back to the PyTorch-facing [B, nclass] layout (wrapper-side plumbing).
    return outT.T[:B]


def init_params(key, nhid, nclass):
    """Match the PyTorch module's init:
       - mlp1.weight, mlp2.weight: normal(std=0.05)
       - biases: default nn.Linear init U(-1/sqrt(fan_in), 1/sqrt(fan_in))
       Weights kept in PyTorch [out, in] layout."""
    k1, k2, k3, k4 = jax.random.split(key, 4)
    w1 = 0.05 * jax.random.normal(k1, (nclass, nhid), dtype=jnp.float32)
    bb1 = 1.0 / (nhid ** 0.5)
    b1 = jax.random.uniform(k2, (nclass,), minval=-bb1, maxval=bb1,
                            dtype=jnp.float32)
    w2 = 0.05 * jax.random.normal(k3, (nclass, nclass), dtype=jnp.float32)
    bb2 = 1.0 / (nclass ** 0.5)
    b2 = jax.random.uniform(k4, (nclass,), minval=-bb2, maxval=bb2,
                            dtype=jnp.float32)
    return w1, b1, w2, b2


if __name__ == "__main__":
    nhid, nclass = 32, 8
    batch = 300                      # not a multiple of the tile on purpose

    key = jax.random.PRNGKey(0)
    kp, kx = jax.random.split(key)
    params = init_params(kp, nhid, nclass)
    x = jax.random.normal(kx, (batch, nhid), dtype=jnp.float32)

    w1, b1, w2, b2 = params
    ref_gpr = jnp.tanh(x @ w1.T + b1) @ w2.T + b2     # GPR=True path
    ref_no = x @ w1.T + b1                            # GPR=False path

    # f32 path, batch_tile=128 -> grid of 3 steps (pipelined, megacore-able).
    out_gpr = jax.block_until_ready(
        mlp_forward(x, params, GPR=True, batch_tile=128))
    out_no = jax.block_until_ready(
        mlp_forward(x, params, GPR=False, batch_tile=128))

    assert out_gpr.shape == (batch, nclass)
    assert out_no.shape == (batch, nclass)
    assert jnp.allclose(out_gpr, ref_gpr, atol=1e-5, rtol=1e-5)
    assert jnp.allclose(out_no, ref_no, atol=1e-5, rtol=1e-5)

    # Default (large) tile -> single grid step; exercises the grid=1 path.
    out_big = jax.block_until_ready(mlp_forward(x, params, GPR=True))
    assert jnp.allclose(out_big, ref_gpr, atol=1e-5, rtol=1e-5)

    # bf16 operand path (f32 MXU accumulation): ~half the HBM traffic.
    out_bf16 = jax.block_until_ready(
        mlp_forward(x, params, GPR=True, batch_tile=128,
                    compute_dtype=jnp.bfloat16))
    assert jnp.allclose(out_bf16, ref_gpr, atol=3e-2, rtol=3e-2)

    print("KERNEL_OK")
</pallas_src>

<mosaic_0001>
module attributes {stable_mosaic.version = 11 : i64} {
  func.func @_mlp_gpr_kernel(%arg0: i32, %arg1: memref<32x128xf32, #tpu.memory_space<vmem>>, %arg2: memref<8x32xf32, #tpu.memory_space<vmem>>, %arg3: memref<8x1xf32, #tpu.memory_space<vmem>>, %arg4: memref<8x8xf32, #tpu.memory_space<vmem>>, %arg5: memref<8x1xf32, #tpu.memory_space<vmem>>, %arg6: memref<8x128xf32, #tpu.memory_space<vmem>>) attributes {dimension_semantics = [#tpu.dimension_semantics<parallel>], iteration_bounds = array<i64: 3>, scalar_prefetch = 0 : i64, scratch_operands = 0 : i64, tpu.core_type = #tpu.core_type<tc>, window_params = [{transform_indices = @transform_0, window_bounds = array<i64: 32, 128>}, {pipeline_mode = #tpu.pipeline_mode<synchronous>, transform_indices = @transform_1, window_bounds = array<i64: 8, 32>}, {pipeline_mode = #tpu.pipeline_mode<synchronous>, transform_indices = @transform_2, window_bounds = array<i64: 8, 1>}, {pipeline_mode = #tpu.pipeline_mode<synchronous>, transform_indices = @transform_3, window_bounds = array<i64: 8, 8>}, {pipeline_mode = #tpu.pipeline_mode<synchronous>, transform_indices = @transform_4, window_bounds = array<i64: 8, 1>}, {transform_indices = @transform_5, window_bounds = array<i64: 8, 128>}]} {
    %c0 = arith.constant 0 : index
    %c0_0 = arith.constant 0 : index
    %0 = vector.load %arg2[%c0, %c0_0] : memref<8x32xf32, #tpu.memory_space<vmem>>, vector<8x32xf32>
    %c0_1 = arith.constant 0 : index
    %c0_2 = arith.constant 0 : index
    %1 = vector.load %arg1[%c0_1, %c0_2] : memref<32x128xf32, #tpu.memory_space<vmem>>, vector<32x128xf32>
    %cst = arith.constant dense<0.000000e+00> : vector<8x128xf32>
    %2 = tpu.matmul %0, %1, %cst {dimension_numbers = #tpu.dot_dimension_numbers<[1], [0], [0], [1], [0, 0, 1, 1], [], []>} : vector<8x32xf32>, vector<32x128xf32>, vector<8x128xf32> -> vector<8x128xf32>
    %c0_3 = arith.constant 0 : index
    %c0_4 = arith.constant 0 : index
    %3 = vector.load %arg3[%c0_3, %c0_4] : memref<8x1xf32, #tpu.memory_space<vmem>>, vector<8x1xf32>
    %4 = vector.broadcast %3 : vector<8x1xf32> to vector<8x128xf32>
    %5 = arith.addf %2, %4 : vector<8x128xf32>
    %6 = math.tanh %5 : vector<8x128xf32>
    %c0_5 = arith.constant 0 : index
    %c0_6 = arith.constant 0 : index
    %7 = vector.load %arg4[%c0_5, %c0_6] : memref<8x8xf32, #tpu.memory_space<vmem>>, vector<8x8xf32>
    %cst_7 = arith.constant dense<0.000000e+00> : vector<8x128xf32>
    %8 = tpu.matmul %7, %6, %cst_7 {dimension_numbers = #tpu.dot_dimension_numbers<[1], [0], [0], [1], [0, 0, 1, 1], [], []>} : vector<8x8xf32>, vector<8x128xf32>, vector<8x128xf32> -> vector<8x128xf32>
    %c0_8 = arith.constant 0 : index
    %c0_9 = arith.constant 0 : index
    %9 = vector.load %arg5[%c0_8, %c0_9] : memref<8x1xf32, #tpu.memory_space<vmem>>, vector<8x1xf32>
    %10 = vector.broadcast %9 : vector<8x1xf32> to vector<8x128xf32>
    %11 = arith.addf %8, %10 : vector<8x128xf32>
    %c0_10 = arith.constant 0 : index
    %c0_11 = arith.constant 0 : index
    %12 = vector.load %arg6[%c0_10, %c0_11] : memref<8x128xf32, #tpu.memory_space<vmem>>, vector<8x128xf32>
    tpu.vector_store %arg6[%c0_10, %c0_11], %11 {strides = array<i32>} : memref<8x128xf32, #tpu.memory_space<vmem>>, vector<8x128xf32>,
    return
  }
  func.func @transform_0(%arg0: i32) -> (i32, i32) {
    %c0_i32 = arith.constant 0 : i32
    %c0_i32_0 = arith.constant 0 : i32
    return %c0_i32, %arg0 : i32, i32
  }
  func.func @transform_1(%arg0: i32) -> (i32, i32) {
    %c0_i32 = arith.constant 0 : i32
    %c0_i32_0 = arith.constant 0 : i32
    %c0_i32_1 = arith.constant 0 : i32
    return %c0_i32, %c0_i32_0 : i32, i32
  }
  func.func @transform_2(%arg0: i32) -> (i32, i32) {
    %c0_i32 = arith.constant 0 : i32
    %c0_i32_0 = arith.constant 0 : i32
    %c0_i32_1 = arith.constant 0 : i32
    return %c0_i32, %c0_i32_0 : i32, i32
  }
  func.func @transform_3(%arg0: i32) -> (i32, i32) {
    %c0_i32 = arith.constant 0 : i32
    %c0_i32_0 = arith.constant 0 : i32
    %c0_i32_1 = arith.constant 0 : i32
    return %c0_i32, %c0_i32_0 : i32, i32
  }
  func.func @transform_4(%arg0: i32) -> (i32, i32) {
    %c0_i32 = arith.constant 0 : i32
    %c0_i32_0 = arith.constant 0 : i32
    %c0_i32_1 = arith.constant 0 : i32
    return %c0_i32, %c0_i32_0 : i32, i32
  }
  func.func @transform_5(%arg0: i32) -> (i32, i32) {
    %c0_i32 = arith.constant 0 : i32
    %c0_i32_0 = arith.constant 0 : i32
    return %c0_i32, %arg0 : i32, i32
  }
}

</mosaic_0001>

<bundles_post_ra>
// kernel: tpu_custom_call.1
= control target key start
LH: loop header
LB: loop body
LE: loop exit
PB: predicated region body
PF: predicated region fallthrough
CT: control target
= control target key end

     0   :  { %10 = vsyncpa [#allocation3], 0  ;;  %s877_s0 = inlined_call_operand.hbm [shape: f32[32,384], index: 0, kind: input, shape index: {}]   ;;  %s878_s1 = inlined_call_operand.vmem [shape: f32[8,32], index: 1, kind: input, shape index: {}]   ;;  %s879_s2 = inlined_call_operand.vmem [shape: f32[8,1], index: 2, kind: input, shape index: {}]   ;;  %s880_s3 = inlined_call_operand.vmem [shape: f32[8,8], index: 3, kind: input, shape index: {}]   ;;  %s881_s4 = inlined_call_operand.vmem [shape: f32[8,1], index: 4, kind: input, shape index: {}]   ;;  %s882_s5 = inlined_call_operand.hbm [shape: f32[8,384], index: 5, kind: output, shape index: {}]  }
   0x1   :  { %12 = vsyncpa [#allocation3 + $0x1], 0 }
   0x2   :  { %13 = vsyncpa [#allocation4], 0 }
   0x3   :  { %15 = vsyncpa [#allocation4 + $0x1], 0  ;;  %s718_s18 = smov 0   ;;  %s720_s19 = smov 0  }
   0x4   :  { %s722_s20 = smov 0   ;;  %s724_s21 = smov 0  }
   0x5 LB: > { %s739_s22 = sadd.s32 4294967295, %s678_s21   ;;  %s494_s23 = sadd.s32 4294967294, %s678_s21   ;;  %s678_s21 = sphi %s724_s21, %s897_s21   ;;  %s674_s20 = sphi %s722_s20, %s896_s20   ;;  %s670_s19 = sphi %s720_s19, %s895_s19   ;;  %s666_s18 = sphi %s718_s18, %s894_s18  }
   0x6   : > { %s743_s24 = sadd.s32 1, %s678_s21   ;;  %s28_s25 = sadd.s32 1, %s674_s20 }
   0x7   : > { %s25_s26 = ssub.s32 %s678_s21, %s743_s24  ;;  %p35_p0 = scmp.ne.s32.totalorder %s674_s20, %s670_s19 }
   0x8   : > { %p26_p1 = scmp.eq.s32.totalorder %s25_s26, 0  ;;  %p36_p2 = scmp.eq.s32.totalorder %s678_s21, 0 }
   0x9   : > { %p41_p3 = scmp.ne.s32.totalorder %s670_s19, %s666_s18  ;;  %p42_p4 = scmp.eq.s32.totalorder %s739_s22, 0 }
   0xa   : > { %s755_s27 = scalar_select %p26_p1, %s674_s20, %s28_s25  }
   0xb   : > { %p757_p5 = por %p36_p2, %p35_p0  ;;  %p761_p6 = por %p42_p4, %p41_p3 }
   0xc   : > { %p149_p7 = scmp.eq.s32.totalorder %s739_s22, 2  ;;  %p155_p8 = scmp.eq.s32.totalorder %s494_s23, 2 }
   0xd   : > { %s886_s29 = scalar_select %p761_p6, 1, 0 }
   0xe   : > { %p543_p9 = scmp.lt.s32.totalorder %s678_s21, 3  ;;  %p767_p10 = por %p149_p7, %p35_p0 }
   0xf   : > { %p771_p11 = por %p155_p8, %p41_p3  ;;  %s187_s7 = sand.u32 1, %s674_s20  }
  0x10   : > { %s887_s30 = scalar_select %p767_p10, 1, 0 }
  0x11   : > { %s888_s6 = scalar_select %p771_p11, 1, 0 }
  0x12   : > { %s498_s8 = sshll.u32 %s678_s21, 7  ;;  %s497_s9 = sshll.u32 %s187_s7, 5 }
  0x13   : > { %s780_s12 = scalar_lea.hbm %s877_s0, %s498_s8  ;;  %s191_s13 = scalar_lea.vmem [#allocation2], %s497_s9 }
  0x14   : > { %s197_s14 = sshll.u32 %s191_s13, 4  ;;  %p784_p12 = pnand %p543_p9, %p757_p5  ;;  %s788_s14 = int_to_ptr.vmem [resolvable:$true] %s197_s14 }
  0x15   : > { %s791_s16 = scalar_lea.sflag [#allocation3], %s187_s7  ;;  %s586_s17 = scalar_lea.hbm %s780_s12, 512 }
  0x16   : > { %p587_p0 = scmp.ne.s32.totalorder %s780_s12, %s586_s17  ;;  %p588_p1 = pneg %p784_p12 }
  0x17   : > { %s591_s26 = scalar_lea.hbm %s877_s0, 1536  ;;  %p592_p4 = scmp.lt.s32.totalorder %s780_s12, %s877_s0 }
  0x18   : > { %p589_p2 = pnand %p588_p1, %p587_p0  ;;  %p593_p5 = scmp.lt.s32.totalorder %s591_s26, %s586_s17 }
  0x1a   : > { %p590_p3 = pneg %p589_p2  ;;  %p594_p7 = por %p593_p5, %p592_p4 }
  0x1c   : > { %p595_p8 = pnand %p594_p7, %p590_p3 }
  0x1e   : > { %598 = shalt.err (!%p595_p8)
}
  0x1f   : > { %s599_s7 = scalar_lea.vmem %s788_s14, 512  ;;  %s680_s9 = smov [#allocation2]  }
  0x20   : > { %p600_p9 = scmp.ne.s32.totalorder %s788_s14, %s599_s7  ;;  %s604_s10 = sshll.u32 %s680_s9, 4  ;;  %s605_s10 = int_to_ptr.vmem [resolvable:$false] %s604_s10 }
  0x21   : > { %s606_s11 = scalar_lea.vmem %s605_s10, 1024  ;;  %p607_p2 = scmp.lt.s32.totalorder %s788_s14, %s605_s10 }
  0x22   : > { %p602_p13 = pnand %p600_p9, %p588_p1  ;;  %p608_p11 = scmp.lt.s32.totalorder %s606_s11, %s599_s7 }
  0x24   : > { %p603_p0 = pneg %p602_p13  ;;  %p609_p10 = por %p608_p11, %p607_p2 }
  0x26   : > { %p610_p6 = pnand %p609_p10, %p603_p0 }
  0x28   : > { %613 = shalt.err (!%p610_p6)
}
  0x29   : > { %s681_s13 = smov 384   ;;  %s682_s17 = smov 128  }
  0x2a   : > { %s683_s23 = smov 8   ;;  %p205_p13 = scmp.lt.s32.totalorder %s678_s21, 4 }
  0x2b   : > { %538 = dma.hbm_to_vmem [thread:$0]  (!%p784_p12), %s780_s12, 512, %s788_s14, %s791_s16, %s681_s13, %s682_s17, %s683_s23  }
  0x2c   : > { %p890_p1 = scmp.ge.s32.totalorder %s678_s21, 1 }
  0x2e   : > { %p206_p3 = pnand %p890_p1, %p205_p13 }
  0x2f   : > { %s816_s25 = sand.u32 (!%p206_p3), 1, %s670_s19   ;;  %p891_p6 = scmp.ne.s32.totalorder (!%p206_p3), %s886_s29, 0 }
  0x30   : > { %209 = sbr.rel (%p206_p3) target bundleno = 482 (0x1e2), region = 40  ;;  %s500_s26 = sshll.u32 (!%p206_p3), %s816_s25, 5 }
  0x31   : > { %s212_s28 = scalar_lea.sflag (!%p206_p3), [#allocation3], %s816_s25  ;;  %s215_s8 = scalar_lea.vmem (!%p206_p3), [#allocation2], %s500_s26 }
  0x35   : > { %657 = dma.done.wait (%p891_p6), %s212_s28, 512  }
  0x36   : > { %659 = vsyncadd (%p891_p6), %s212_s28, 4294966784  ;;  %v684_v0 = vmov 0.0   ;;  %vm685_vm0 = vmmov 0   ;;  %v686_v1 = vmov 0   ;;  %v246_v2 = vld [vmem:[%s215_s8 + $0x18] sm:$0xff]  ;;  %v245_v3 = vld [vmem:[%s215_s8 + $0x10] sm:$0xff] }
  0x37   : > { %515 = vmatprep.subr.mxu0 %v684_v0  ;;  %523 = vmatprep.mubr.msk.f32.mxu0 %vm685_vm0, %v684_v0  ;;  %v247_v4 = vld [vmem:[%s879_s2] sm:$0xff]  ;;  %v244_v5 = vld [vmem:[%s215_s8 + $0x8] sm:$0xff]  ;;  %vm253_vm1 = vcmask 261120   ;;  %vm335_vm2 = vcmask 64512   ;;  %s501_s11 = sshll.u32 %s816_s25, 3  ;;  %s505_s13 = sshll.u32 %s739_s22, 7 }
  0x38   : > { %583 = vset.pattern.permute.xlu0 %v686_v1  ;;  %526 = vmatprep.subr.mxu1 %v684_v0  ;;  %v329_v6 = vld [vmem:[%s881_s4] sm:$0xff]  ;;  %s241_s17 = scalar_lea.vmem [#allocation5], %s501_s11  ;;  %s411_s12 = scalar_lea.sflag [#allocation4], %s816_s25 }
  0x39   : > { %528 = vmatprep.mubr.msk.f32.mxu1 %vm685_vm0, %v684_v0  ;;  %516 = vmatpush3.msra.mxu0 %v246_v2  ;;  %v243_v7 = vld [vmem:[%s215_s8] sm:$0xff]  ;;  %s424_s23 = sshll.u32 %s241_s17, 4  ;;  %s841_s8 = scalar_lea.hbm %s882_s5, %s505_s13  ;;  %s425_s23 = int_to_ptr.vmem [resolvable:$true] %s424_s23 }
  0x3a   : > { %517 = vmatprep.subr.mxu0 %v684_v0  ;;  %250 = vperm.xlu0 %583, %v247_v4   ;;  %v242_v8 = vld [vmem:[%s878_s1] sm:$0xff]  ;;  %s614_s14 = scalar_lea.vmem %s425_s23, 128  ;;  %p892_p11 = scmp.ne.s32.totalorder %s887_s30, 0 }
  0x3b   : > { %518 = vmatpush3.msra.mxu0 %v245_v3  ;;  %v328_v13 = vld [vmem:[%s880_s3] sm:$0xff]  ;;  %p615_p10 = scmp.ne.s32.totalorder %s425_s23, %s614_s14  ;;  %s687_s22 = smov [#allocation5]  }
  0x3c   : > { %519 = vmatprep.subr.mxu0 %v684_v0  ;;  %s618_s29 = sshll.u32 %s687_s22, 4  ;;  %s619_s29 = int_to_ptr.vmem [resolvable:$false] %s618_s29 }
  0x3d   : > { %520 = vmatpush3.msra.mxu0 %v244_v5  ;;  %p616_p12 = pnand %p615_p10, %p892_p11  ;;  %s620_s15 = scalar_lea.vmem %s619_s29, 256 }
  0x3e   : > { %521 = vmatprep.subr.mxu0 %v684_v0  ;;  %332 = vperm.xlu0 %583, %v329_v6   ;;  %p621_p5 = scmp.lt.s32.totalorder %s425_s23, %s619_s29  ;;  %p622_p7 = scmp.lt.s32.totalorder %s620_s15, %s614_s14 }
  0x3f   : > { %522 = vmatpush3.msra.mxu0 %v243_v7  ;;  %p617_p4 = pneg %p616_p12 }
  0x40   : > { %524 = vmatmul.mubr.msk.f32.vlgmr.msra.gmra.mxu0 %vm253_vm1, %v242_v8  ;;  %p623_p8 = por %p622_p7, %p621_p5 }
  0x42   : > { %p624_p9 = pnand %p623_p8, %p617_p4 }
  0xb5   : > { %v251_v9 = vpop.permute.xlu0 %250 }
  0xb9   : > { %v333_v15 = vpop.permute.xlu0 %332 }
 0x100   : > { %v323_v10 = vpop.f32.mrf.mxu0 }
 0x101   : > { %v324_v11 = vadd.f32 %v323_v10, %v251_v9 }
 0x102   : > { %v525_v12 = vpop.f32.mrf.mxu0 }
 0x103   : > { %584 = vtanh.f32 %v324_v11 }
 0x110   : > { %v585_v14 = vpop.eup %584 }
 0x111   : > { %527 = vmatpush3.msra.mxu1 %v585_v14 }
 0x112   : > { %529 = vmatmul.mubr.msk.f32.vlgmr.msra.gmra.mxu1 %vm335_vm2, %v328_v13 }
 0x1d2   : > { %v405_v16 = vpop.f32.mrf.mxu1 }
 0x1d3   : > { %v406_v17 = vadd.f32 %v405_v16, %v333_v15 }
 0x1d4   : > { %v530_v18 = vpop.f32.mrf.mxu1 }
 0x1d5   : > { %409 = vst [vmem:[%s241_s17] sm:$0xff] %v406_v17 }
 0x1d6   : > { %627 = shalt.err (!%p624_p9)
}
 0x1d7   : > { %s628_s16 = scalar_lea.hbm %s841_s8, 128  ;;  %s632_s9 = scalar_lea.hbm %s882_s5, 384 }
 0x1d8   : > { %p629_p0 = scmp.ne.s32.totalorder %s841_s8, %s628_s16  ;;  %p633_p1 = scmp.lt.s32.totalorder %s841_s8, %s882_s5 }
 0x1d9   : > { %p634_p3 = scmp.lt.s32.totalorder %s632_s9, %s628_s16 }
 0x1da   : > { %p630_p2 = pnand %p629_p0, %p892_p11 }
 0x1db   : > { %p635_p6 = por %p634_p3, %p633_p1 }
 0x1dc   : > { %p631_p13 = pneg %p630_p2 }
 0x1de   : > { %p636_p10 = pnand %p635_p6, %p631_p13 }
 0x1e0   : > { %639 = shalt.err (!%p636_p10)
}
 0x1e1   : > { %533 = dma.vmem_to_hbm [thread:$0]  (%p892_p11), %s425_s23, 128, %s841_s8, %s411_s12  }
 0x1e2 PF: > { %p544_p12 = scmp.ge.s32.totalorder %s678_s21, 2  ;;  %s436_s13 = sand.u32 1, %s666_s18  }
 0x1e3   : > { %p893_p4 = scmp.ne.s32.totalorder %s888_s6, 0  ;;  %s437_s17 = scalar_lea.sflag [#allocation4], %s436_s13 }
 0x1e5   : > { %p540_p5 = pnand %p544_p12, %p893_p4 }
 0x1e7   : > { %p541_p7 = pneg %p540_p5 }
 0x1e9   : > { %661 = dma.done.wait (%p541_p7), %s437_s17, 128  }
 0x1ea   : > { %663 = vsyncadd (%p541_p7), %s437_s17, 4294967168  ;;  %p18_p8 = scmp.ge.s32.totalorder %s743_s24, 5   ;;  %s894_s18 = smov %s670_s19 }
 0x1eb   : > { %s895_s19 = smov %s674_s20  ;;  %s896_s20 = smov %s755_s27 }
 0x1ec   : > { %s897_s21 = smov %s743_s24  ;;  %20 = sbr.rel (!%p18_p8) target bundleno = 5 (0x5), region = 85 }
 0x1f1   :  { %442 = vsyncpa [#allocation3], 1 }
 0x1f2   :  { %444 = vsyncpa [#allocation3 + $0x1], 1 }
 0x1f3   :  { %445 = vsyncpa [#allocation4], 1 }
 0x1f4   :  { %447 = vsyncpa [#allocation4 + $0x1], 1 }

</bundles_post_ra>
